<compile_context>
chip_gen: v7x
topology: tpu7x:2x2x1
jax: 0.10.0
libtpu: 0.0.40
codegen_flags: <defaults>
</compile_context>

<pallas_src>
import functools

import jax
import jax.numpy as jnp
from jax.experimental import pallas as pl
from jax.experimental.pallas import tpu as pltpu


# ---------------------------------------------------------------------------
# Kernel
# ---------------------------------------------------------------------------
def _ffn_kernel(x_ref, wg_ref, wu_ref, wd_ref, o_ref, acc_ref):
    """One (token-tile, intermediate-tile) step of the SwiGLU FFN.

    x_ref:   (tm, H)      token tile (resident across the i axis)
    wg_ref:  (H, ti)      gate_proj weight slice for this I-tile
    wu_ref:  (H, ti)      up_proj   weight slice for this I-tile
    wd_ref:  (ti, H)      down_proj weight slice for this I-tile
    o_ref:   (tm, H)      output tile (written once, at the last I-tile)
    acc_ref: (tm, H) f32  VMEM accumulator, resident across the i axis
    """
    i = pl.program_id(1)
    n_i = pl.num_programs(1)

    @pl.when(i == 0)
    def _init():
        acc_ref[...] = jnp.zeros_like(acc_ref)

    x = x_ref[...]

    # gate / up projections on the MXU, f32 accumulation.
    gate = jnp.dot(x, wg_ref[...], preferred_element_type=jnp.float32)
    up = jnp.dot(x, wu_ref[...], preferred_element_type=jnp.float32)

    # SiLU / Swish in f32: g * sigmoid(g) (sigmoid -> EUP, muls -> VPU).
    h = (gate * jax.nn.sigmoid(gate)) * up                      # (tm, ti) f32

    # Partial down-projection for this slice of the intermediate dim.
    partial = jnp.dot(h.astype(wd_ref.dtype), wd_ref[...],
                      preferred_element_type=jnp.float32)       # (tm, H) f32

    # Fuse the final accumulate with the output write (saves a full tm x H
    # f32 store + reload on the last step).
    @pl.when(i < n_i - 1)
    def _accumulate():
        acc_ref[...] += partial

    @pl.when(i == n_i - 1)
    def _finish():
        o_ref[...] = (acc_ref[...] + partial).astype(o_ref.dtype)


# ---------------------------------------------------------------------------
# Tile selection / VMEM budgeting
# ---------------------------------------------------------------------------
def _vmem_need_bytes(tm, ti, H, x_bytes, w_bytes):
    """Estimated VMEM footprint of one grid step (double-buffered specs)."""
    return (
        2 * tm * H * x_bytes        # x tile, 2 buffers
        + 2 * tm * H * x_bytes      # out tile, 2 buffers
        + 2 * H * ti * w_bytes      # gate weight tile, 2 buffers
        + 2 * H * ti * w_bytes      # up weight tile, 2 buffers
        + 2 * ti * H * w_bytes      # down weight tile, 2 buffers
        + tm * H * 4                # f32 accumulator scratch
        + 3 * tm * ti * 4           # gate / up / h f32 intermediates
        + tm * H * 4                # partial f32 temp
    )


def _vmem_capacity_bytes():
    """Physical per-core VMEM capacity; conservative fallback = 64 MiB (v7x)."""
    try:
        return int(pltpu.get_tpu_info().vmem_capacity_bytes)
    except Exception:
        return 64 << 20


def _select_tiles(M, H, I, x_bytes, w_bytes, budget, tm=None, ti=None):
    """Largest token tile (then ti=512-preferred) whose footprint fits `budget`."""
    tm_prefs = (2048, 1024, 768, 512, 384, 256, 192, 128, 64, 32, 16, 8)
    ti_prefs = (512, 256, 1024, 128)
    tm_cands = ([tm] if tm is not None
                else ([c for c in tm_prefs if c <= M and M % c == 0] or [M]))
    ti_cands = ([ti] if ti is not None
                else ([c for c in ti_prefs if c <= I and I % c == 0] or [I]))
    for tm_c in tm_cands:               # largest tm first: weight reuse ~ tm
        for ti_c in ti_cands:
            if _vmem_need_bytes(tm_c, ti_c, H, x_bytes, w_bytes) <= budget:
                return tm_c, ti_c
    return tm_cands[-1], min(ti_cands)  # nothing fits cleanly: smallest tiles


# ---------------------------------------------------------------------------
# Host wrapper
# ---------------------------------------------------------------------------
@functools.partial(jax.jit, static_argnames=("tm", "ti", "vmem_limit"))
def _llama_ffn_2d(x2d, wg_t, wu_t, wd_t, *, tm, ti, vmem_limit):
    M, H = x2d.shape
    I = wg_t.shape[1]
    n_m = M // tm
    n_i = I // ti

    x_bytes = jnp.dtype(x2d.dtype).itemsize
    w_bytes = jnp.dtype(wg_t.dtype).itemsize

    # Cost hint: weights are re-streamed once per token tile (n_m times).
    flops = 6 * M * H * I                         # 3 matmuls x 2*M*H*I
    bytes_accessed = (2 * M * H * x_bytes         # x in + out
                      + 3 * H * I * w_bytes * n_m)
    cost = pl.CostEstimate(flops=flops, transcendentals=M * I,
                           bytes_accessed=bytes_accessed)

    return pl.pallas_call(
        _ffn_kernel,
        out_shape=jax.ShapeDtypeStruct((M, H), x2d.dtype),
        grid_spec=pltpu.PrefetchScalarGridSpec(
            num_scalar_prefetch=0,
            grid=(n_m, n_i),
            in_specs=[
                pl.BlockSpec((tm, H), lambda m, i: (m, 0)),   # x tile
                pl.BlockSpec((H, ti), lambda m, i: (0, i)),   # gate weight tile
                pl.BlockSpec((H, ti), lambda m, i: (0, i)),   # up weight tile
                pl.BlockSpec((ti, H), lambda m, i: (i, 0)),   # down weight tile
            ],
            out_specs=pl.BlockSpec((tm, H), lambda m, i: (m, 0)),
            scratch_shapes=[pltpu.VMEM((tm, H), jnp.float32)],
        ),
        compiler_params=pltpu.CompilerParams(
            dimension_semantics=("parallel", "arbitrary"),
            vmem_limit_bytes=vmem_limit,
        ),
        cost_estimate=cost,
    )(x2d, wg_t, wu_t, wd_t)


def llama_ffn(x, wg_t, wu_t, wd_t, *, tm=None, ti=None):
    """SwiGLU FFN.

    x:    [B, S, H]
    wg_t: [H, I]  gate_proj weight, transposed vs torch nn.Linear ([in, out])
    wu_t: [H, I]  up_proj   weight, transposed
    wd_t: [I, H]  down_proj weight, transposed
    returns [B, S, H]
    """
    B, S, H = x.shape
    I = wg_t.shape[1]
    M = B * S

    x_bytes = jnp.dtype(x.dtype).itemsize
    w_bytes = jnp.dtype(wg_t.dtype).itemsize

    vmem_cap = _vmem_capacity_bytes()
    budget = max(vmem_cap - (8 << 20), vmem_cap // 2)   # headroom for Mosaic scratch
    tm, ti = _select_tiles(M, H, I, x_bytes, w_bytes, budget, tm=tm, ti=ti)
    assert M % tm == 0, f"tm={tm} must divide M={M}"
    assert I % ti == 0, f"ti={ti} must divide I={I}"

    vmem_need = _vmem_need_bytes(tm, ti, H, x_bytes, w_bytes)
    vmem_limit = int(min(vmem_need + (6 << 20), vmem_cap))

    out2d = _llama_ffn_2d(x.reshape(M, H), wg_t, wu_t, wd_t,
                          tm=tm, ti=ti, vmem_limit=vmem_limit)
    return out2d.reshape(B, S, H)


def llama_ffn_ref(x, wg_t, wu_t, wd_t):
    """Pure-JAX reference matching the PyTorch forward semantics."""
    gate = jnp.einsum("bsh,hi->bsi", x, wg_t)
    up = jnp.einsum("bsh,hi->bsi", x, wu_t)
    swish = gate * jax.nn.sigmoid(gate)
    return jnp.einsum("bsi,ih->bsh", swish * up, wd_t)


# ---------------------------------------------------------------------------
# Demo / correctness check
# ---------------------------------------------------------------------------
if __name__ == "__main__":
    key = jax.random.PRNGKey(0)

    def make_params(k, H, I, dtype):
        kg, ku, kd = jax.random.split(k, 3)
        sh = 1.0 / jnp.sqrt(jnp.float32(H))
        si = 1.0 / jnp.sqrt(jnp.float32(I))
        wg = jax.random.uniform(kg, (H, I), jnp.float32, -sh, sh).astype(dtype)
        wu = jax.random.uniform(ku, (H, I), jnp.float32, -sh, sh).astype(dtype)
        wd = jax.random.uniform(kd, (I, H), jnp.float32, -si, si).astype(dtype)
        return wg, wu, wd

    # 1) Toy shape implied by the module (full-extent tile fallback path).
    B, S, H, I = 2, 8, 32, 64
    kx, kp, key = jax.random.split(key, 3)
    x = jax.random.normal(kx, (B, S, H), jnp.float32)
    wg, wu, wd = make_params(kp, H, I, jnp.float32)
    out = jax.block_until_ready(llama_ffn(x, wg, wu, wd))
    ref = llama_ffn_ref(x, wg, wu, wd)
    assert out.shape == (B, S, H), out.shape
    assert jnp.allclose(out, ref, atol=1e-5, rtol=1e-5), "mismatch (toy shape)"

    # 2) Lane/sublane-aligned shape exercising both grid axes (token tiling +
    #    intermediate-dim accumulation + fused final write) with explicit tiles.
    B, S, H, I = 2, 64, 128, 256
    kx, kp, key = jax.random.split(key, 3)
    x = jax.random.normal(kx, (B, S, H), jnp.float32)
    wg, wu, wd = make_params(kp, H, I, jnp.float32)
    out = jax.block_until_ready(llama_ffn(x, wg, wu, wd, tm=64, ti=128))
    ref = llama_ffn_ref(x, wg, wu, wd)
    assert jnp.allclose(out, ref, atol=1e-4, rtol=1e-4), "mismatch (tiled path)"

    # 3) Same shape, auto tile selection (largest-fit path).
    out = jax.block_until_ready(llama_ffn(x, wg, wu, wd))
    assert jnp.allclose(out, ref, atol=1e-4, rtol=1e-4), "mismatch (auto tiles)"

    print("KERNEL_OK")
</pallas_src>

<mosaic_0001>
module attributes {stable_mosaic.version = 11 : i64} {
  func.func @_ffn_kernel(%arg0: i32, %arg1: i32, %arg2: memref<16x32xf32, #tpu.memory_space<vmem>>, %arg3: memref<32x64xf32, #tpu.memory_space<vmem>>, %arg4: memref<32x64xf32, #tpu.memory_space<vmem>>, %arg5: memref<64x32xf32, #tpu.memory_space<vmem>>, %arg6: memref<16x32xf32, #tpu.memory_space<vmem>>, %arg7: memref<16x32xf32, #tpu.memory_space<vmem>>) attributes {dimension_semantics = [#tpu.dimension_semantics<parallel>, #tpu.dimension_semantics<arbitrary>], iteration_bounds = array<i64: 1, 1>, scalar_prefetch = 0 : i64, scratch_operands = 1 : i64, tpu.core_type = #tpu.core_type<tc>, window_params = [{transform_indices = @transform_0, window_bounds = array<i64: 16, 32>}, {transform_indices = @transform_1, window_bounds = array<i64: 32, 64>}, {transform_indices = @transform_2, window_bounds = array<i64: 32, 64>}, {transform_indices = @transform_3, window_bounds = array<i64: 64, 32>}, {transform_indices = @transform_4, window_bounds = array<i64: 16, 32>}]} {
    %c0_i32 = arith.constant 0 : i32
    %0 = arith.cmpi eq, %arg1, %c0_i32 : i32
    %1 = arith.extui %0 : i1 to i32
    %c0_i32_0 = arith.constant 0 : i32
    %2 = arith.cmpi ne, %1, %c0_i32_0 : i32
    scf.if %2 {
      %cst_15 = arith.constant 0.000000e+00 : f32
      %23 = vector.broadcast %cst_15 : f32 to vector<16x32xf32>
      %c0_16 = arith.constant 0 : index
      %c0_17 = arith.constant 0 : index
      %24 = vector.load %arg7[%c0_16, %c0_17] : memref<16x32xf32, #tpu.memory_space<vmem>>, vector<16x32xf32>
      tpu.vector_store %arg7[%c0_16, %c0_17], %23 {strides = array<i32>} : memref<16x32xf32, #tpu.memory_space<vmem>>, vector<16x32xf32>,
    } else {
    }
    %c0 = arith.constant 0 : index
    %c0_1 = arith.constant 0 : index
    %3 = vector.load %arg2[%c0, %c0_1] : memref<16x32xf32, #tpu.memory_space<vmem>>, vector<16x32xf32>
    %c0_2 = arith.constant 0 : index
    %c0_3 = arith.constant 0 : index
    %4 = vector.load %arg3[%c0_2, %c0_3] : memref<32x64xf32, #tpu.memory_space<vmem>>, vector<32x64xf32>
    %cst = arith.constant dense<0.000000e+00> : vector<16x64xf32>
    %5 = tpu.matmul %3, %4, %cst {dimension_numbers = #tpu.dot_dimension_numbers<[1], [0], [0], [1], [0, 0, 1, 1], [], []>} : vector<16x32xf32>, vector<32x64xf32>, vector<16x64xf32> -> vector<16x64xf32>
    %c0_4 = arith.constant 0 : index
    %c0_5 = arith.constant 0 : index
    %6 = vector.load %arg4[%c0_4, %c0_5] : memref<32x64xf32, #tpu.memory_space<vmem>>, vector<32x64xf32>
    %cst_6 = arith.constant dense<0.000000e+00> : vector<16x64xf32>
    %7 = tpu.matmul %3, %6, %cst_6 {dimension_numbers = #tpu.dot_dimension_numbers<[1], [0], [0], [1], [0, 0, 1, 1], [], []>} : vector<16x32xf32>, vector<32x64xf32>, vector<16x64xf32> -> vector<16x64xf32>
    %8 = arith.negf %5 : vector<16x64xf32>
    %9 = math.exp %8 : vector<16x64xf32>
    %cst_7 = arith.constant 1.000000e+00 : f32
    %10 = vector.broadcast %cst_7 : f32 to vector<16x64xf32>
    %11 = arith.addf %10, %9 : vector<16x64xf32>
    %12 = arith.divf %10, %11 : vector<16x64xf32>
    %13 = arith.mulf %5, %12 : vector<16x64xf32>
    %14 = arith.mulf %13, %7 : vector<16x64xf32>
    %c0_8 = arith.constant 0 : index
    %c0_9 = arith.constant 0 : index
    %15 = vector.load %arg5[%c0_8, %c0_9] : memref<64x32xf32, #tpu.memory_space<vmem>>, vector<64x32xf32>
    %cst_10 = arith.constant dense<0.000000e+00> : vector<16x32xf32>
    %16 = tpu.matmul %14, %15, %cst_10 {dimension_numbers = #tpu.dot_dimension_numbers<[1], [0], [0], [1], [0, 0, 1, 1], [], []>} : vector<16x64xf32>, vector<64x32xf32>, vector<16x32xf32> -> vector<16x32xf32>
    %c0_i32_11 = arith.constant 0 : i32
    %17 = arith.cmpi slt, %arg1, %c0_i32_11 : i32
    %18 = arith.extui %17 : i1 to i32
    %c0_i32_12 = arith.constant 0 : i32
    %19 = arith.cmpi ne, %18, %c0_i32_12 : i32
    scf.if %19 {
      %c0_15 = arith.constant 0 : index
      %c0_16 = arith.constant 0 : index
      %23 = vector.load %arg7[%c0_15, %c0_16] : memref<16x32xf32, #tpu.memory_space<vmem>>, vector<16x32xf32>
      %24 = arith.addf %23, %16 : vector<16x32xf32>
      %c0_17 = arith.constant 0 : index
      %c0_18 = arith.constant 0 : index
      %25 = vector.load %arg7[%c0_17, %c0_18] : memref<16x32xf32, #tpu.memory_space<vmem>>, vector<16x32xf32>
      tpu.vector_store %arg7[%c0_17, %c0_18], %24 {strides = array<i32>} : memref<16x32xf32, #tpu.memory_space<vmem>>, vector<16x32xf32>,
    } else {
    }
    %c0_i32_13 = arith.constant 0 : i32
    %20 = arith.cmpi eq, %arg1, %c0_i32_13 : i32
    %21 = arith.extui %20 : i1 to i32
    %c0_i32_14 = arith.constant 0 : i32
    %22 = arith.cmpi ne, %21, %c0_i32_14 : i32
    scf.if %22 {
      %c0_15 = arith.constant 0 : index
      %c0_16 = arith.constant 0 : index
      %23 = vector.load %arg7[%c0_15, %c0_16] : memref<16x32xf32, #tpu.memory_space<vmem>>, vector<16x32xf32>
      %24 = arith.addf %23, %16 : vector<16x32xf32>
      %c0_17 = arith.constant 0 : index
      %c0_18 = arith.constant 0 : index
      %25 = vector.load %arg6[%c0_17, %c0_18] : memref<16x32xf32, #tpu.memory_space<vmem>>, vector<16x32xf32>
      tpu.vector_store %arg6[%c0_17, %c0_18], %24 {strides = array<i32>} : memref<16x32xf32, #tpu.memory_space<vmem>>, vector<16x32xf32>,
    } else {
    }
    return
  }
  func.func @transform_0(%arg0: i32, %arg1: i32) -> (i32, i32) {
    %c0_i32 = arith.constant 0 : i32
    %c0_i32_0 = arith.constant 0 : i32
    return %arg0, %c0_i32 : i32, i32
  }
  func.func @transform_1(%arg0: i32, %arg1: i32) -> (i32, i32) {
    %c0_i32 = arith.constant 0 : i32
    %c0_i32_0 = arith.constant 0 : i32
    return %c0_i32, %arg1 : i32, i32
  }
  func.func @transform_2(%arg0: i32, %arg1: i32) -> (i32, i32) {
    %c0_i32 = arith.constant 0 : i32
    %c0_i32_0 = arith.constant 0 : i32
    return %c0_i32, %arg1 : i32, i32
  }
  func.func @transform_3(%arg0: i32, %arg1: i32) -> (i32, i32) {
    %c0_i32 = arith.constant 0 : i32
    %c0_i32_0 = arith.constant 0 : i32
    return %arg1, %c0_i32 : i32, i32
  }
  func.func @transform_4(%arg0: i32, %arg1: i32) -> (i32, i32) {
    %c0_i32 = arith.constant 0 : i32
    %c0_i32_0 = arith.constant 0 : i32
    return %arg0, %c0_i32 : i32, i32
  }
}

</mosaic_0001>

<bundles_post_ra>
// kernel: _llama_ffn_2d.1
= control target key start
LH: loop header
LB: loop body
LE: loop exit
PB: predicated region body
PF: predicated region fallthrough
CT: control target
= control target key end

     0   :  { %vm22_vm0 = vcmask 261120   ;;  %v472_v5 = vmov 0.0   ;;  %s575_s0 = inlined_call_operand.vmem [shape: f32[16,32], index: 0, kind: input, shape index: {}]   ;;  %s576_s1 = inlined_call_operand.vmem [shape: f32[32,64], index: 1, kind: input, shape index: {}]   ;;  %s577_s2 = inlined_call_operand.vmem [shape: f32[32,64], index: 2, kind: input, shape index: {}]   ;;  %s578_s3 = inlined_call_operand.vmem [shape: f32[64,32], index: 3, kind: input, shape index: {}]   ;;  %s579_s4 = inlined_call_operand.hbm [shape: f32[16,32], index: 4, kind: output, shape index: {}]  }
   0x1   :  { %v27_v0 = vld [vmem:[%s576_s1] sm:$0xff]  ;;  %v28_v1 = vld [vmem:[%s576_s1 + $0x8] sm:$0xff]  ;;  %v29_v2 = vld [vmem:[%s576_s1 + $0x10] sm:$0xff]  ;;  %23 = vst.msk [vmem:[#allocation2] sm:$0xff] %vm22_vm0, %v472_v5 }
   0x2   :  { %v404_v3 = vpack.c.bf16 %v28_v1, %v27_v0  ;;  %v30_v4 = vld [vmem:[%s576_s1 + $0x18] sm:$0xff]  ;;  %24 = vst.msk [vmem:[#allocation2 + $0x8] sm:$0xff] %vm22_vm0, %v472_v5  ;;  %v25_v6 = vld [vmem:[%s575_s0] sm:$0xff]  ;;  %v114_v9 = vld [vmem:[%s577_s2 + $0x8] sm:$0xff] }
   0x3   :  { %v408_v7 = vpack.c.bf16 %v30_v4, %v29_v2  ;;  %371 = vmatprep.mubr.msk.f32.mxu1 %vm22_vm0, %v25_v6  ;;  %v113_v8 = vld [vmem:[%s577_s2] sm:$0xff] }
   0x4   :  { %405 = vmatprep.subr.bf16.mxu1 %v404_v3 }
   0x5   :  { %9 = vsyncpa [#allocation4], 0  ;;  %407 = vmatpush3.bf16.msra.mxu1 %v404_v3  ;;  %v412_v10 = vpack.c.bf16 %v114_v9, %v113_v8  ;;  %v115_v11 = vld [vmem:[%s577_s2 + $0x10] sm:$0xff]  ;;  %v116_v12 = vld [vmem:[%s577_s2 + $0x18] sm:$0xff]  ;;  %vm216_vm1 = vcmask 523264  }
   0x6   :  { %409 = vmatprep.subr.bf16.mxu1 %v408_v7  ;;  %v26_v13 = vld [vmem:[%s575_s0 + $0x8] sm:$0xff]  ;;  %v416_v14 = vpack.c.bf16 %v116_v12, %v115_v11  ;;  %v208_v15 = vld [vmem:[%s578_s3] sm:$0xff]  ;;  %v210_v18 = vld [vmem:[%s578_s3 + $0x10] sm:$0xff] }
   0x7   :  { %v209_v16 = vld [vmem:[%s578_s3 + $0x8] sm:$0xff]  ;;  %v211_v19 = vld [vmem:[%s578_s3 + $0x18] sm:$0xff]  ;;  %v212_v21 = vld [vmem:[%s578_s3 + $0x20] sm:$0xff] }
   0x8   :  { %v420_v17 = vpack.c.bf16 %v209_v16, %v208_v15  ;;  %v424_v20 = vpack.c.bf16 %v211_v19, %v210_v18  ;;  %v213_v22 = vld [vmem:[%s578_s3 + $0x28] sm:$0xff]  ;;  %v214_v24 = vld [vmem:[%s578_s3 + $0x30] sm:$0xff]  ;;  %v215_v25 = vld [vmem:[%s578_s3 + $0x38] sm:$0xff]  ;;  %s473_s3 = smov [#allocation3]  }
   0x9   :  { %411 = vmatpush3.bf16.msra.mxu1 %v408_v7  ;;  %v428_v23 = vpack.c.bf16 %v213_v22, %v212_v21  ;;  %v432_v26 = vpack.c.bf16 %v215_v25, %v214_v24  ;;  %v312_v43 = vld [vmem:[#allocation2 + $0x8] sm:$0xff]  ;;  %s322_s22 = sshll.u32 %s473_s3, 4  ;;  %v311_v44 = vld [vmem:[#allocation2] sm:$0xff]  ;;  %s323_s22 = int_to_ptr.vmem [resolvable:$true] %s322_s22 }
   0xa   :  { %413 = vmatprep.subr.bf16.mxu1 %v412_v10  ;;  %421 = vmatprep.subr.bf16.mxu0 %v420_v17  ;;  %s448_s23 = scalar_lea.vmem %s323_s22, 256  ;;  %p453_p1 = scmp.lt.s32.totalorder %s323_s22, %s323_s22 }
   0xb   :  { %423 = vmatpush3.bf16.msra.mxu0 %v420_v17  ;;  %p449_p0 = scmp.ne.s32.totalorder %s323_s22, %s448_s23  ;;  %p454_p2 = scmp.lt.s32.totalorder %s448_s23, %s448_s23 }
   0xc   :  { %372 = vmatmul.mubr.msk.f32.vlgmr.msra.gmra.mrb[0].mxu1 %vm22_vm0, %v26_v13  ;;  %425 = vmatprep.subr.bf16.mxu0 %v424_v20 }
   0xd   :  { %415 = vmatpush3.bf16.msra.mxu1 %v412_v10  ;;  %382 = vmatprep.mubr.msk.f32.mxu1 %vm22_vm0, %v25_v6  ;;  %p455_p3 = por %p454_p2, %p453_p1 }
   0xe   :  { %417 = vmatprep.subr.bf16.mxu1 %v416_v14 }
   0xf   :  { %427 = vmatpush3.bf16.msra.mxu0 %v424_v20  ;;  %p456_p4 = pnand %p455_p3, %p449_p0 }
  0x10   :  { %429 = vmatprep.subr.bf16.mxu0 %v428_v23 }
  0x11   :  { %419 = vmatpush3.bf16.msra.mxu1 %v416_v14 }
  0x13   :  { %431 = vmatpush3.bf16.msra.mxu0 %v428_v23 }
  0x14   :  { %383 = vmatmul.mubr.msk.f32.vlgmr.msra.gmra.mrb[2].mxu1 %vm22_vm0, %v26_v13  ;;  %433 = vmatprep.subr.bf16.mxu0 %v432_v26 }
  0x17   :  { %435 = vmatpush3.bf16.msra.mxu0 %v432_v26 }
  0xdf   :  { %v373_v27 = vpop.f32.mrb[0].mxu1 }
  0xe0   :  { %v338_v28 = vmul.f32 -1.442695, %v373_v27  ;;  %v104_v29 = vpop.f32.mrb[1].mxu1 }
  0xe1   :  { %v337_v30 = vmul.f32 -1.442695, %v104_v29 }
  0xe2   :  { %440 = vpow2.f32 %v338_v28 }
  0xe3   :  { %442 = vpow2.f32 %v337_v30 }
  0xe7   :  { %v384_v31 = vpop.f32.mrb[2].mxu1 }
  0xe8   :  { %v183_v32 = vpop.f32.mrb[3].mxu1 }
  0xec   :  { %v441_v33 = vpop.eup %440 }
  0xed   :  { %v443_v34 = vpop.eup %442  ;;  %v199_v35 = vadd.f32 1.0, %v441_v33 }
  0xee   :  { %v198_v36 = vadd.f32 1.0, %v443_v34 }
  0xef   :  { %444 = vrcp.f32 %v199_v35 }
  0xf0   :  { %446 = vrcp.f32 %v198_v36 }
  0xf9   :  { %v445_v37 = vpop.eup %444 }
  0xfa   :  { %v447_v38 = vpop.eup %446  ;;  %v205_v39 = vmul.f32 %v445_v37, %v373_v27 }
  0xfb   :  { %v204_v40 = vmul.f32 %v447_v38, %v104_v29 }
  0xfc   :  { %v207_v41 = vmul.f32 %v384_v31, %v205_v39 }
  0xfd   :  { %v206_v42 = vmul.f32 %v204_v40, %v183_v32 }
  0xff   :  { %401 = vmatprep.mubr.msk.f32.mxu0 %vm216_vm1, %v206_v42 }
 0x100   :  { %402 = vmatmul.mubr.msk.f32.vlgmr.msra.gmra.mrb[0].mxu0 %vm216_vm1, %v207_v41 }
 0x1d3   :  { %v403_v45 = vpop.f32.mrb[0].mxu0 }
 0x1d4   :  { %v314_v46 = vadd.f32 %v403_v45, %v312_v43  ;;  %v289_v47 = vpop.f32.mrb[1].mxu0 }
 0x1d5   :  { %v313_v48 = vadd.f32 %v311_v44, %v289_v47 }
 0x1d6   :  { %316 = vst.msk [vmem:[#allocation3 + $0x8] sm:$0xff] %vm22_vm0, %v314_v46 }
 0x1d7   :  { %315 = vst.msk [vmem:[#allocation3] sm:$0xff] %vm22_vm0, %v313_v48 }
 0x1d8   :  { %459 = shalt.err (!%p456_p4)
}
 0x1d9   :  { %s460_s26 = scalar_lea.hbm %s579_s4, 256 }
 0x1da   :  { %p461_p5 = scmp.ne.s32.totalorder %s579_s4, %s460_s26  ;;  %p464_p6 = scmp.lt.u32.totalorder %s460_s26, %s579_s4 }
 0x1dc   :  { %p466_p7 = pnand %p464_p6, %p461_p5 }
 0x1de   :  { %469 = shalt.err (!%p466_p7)
}
 0x1df   :  { %s474_s30 = smov 128   ;;  %s475_s5 = smov 8  }
 0x1e0   :  { %328 = dma.vmem_to_hbm [thread:$0]  %s323_s22, 256, %s579_s4, [#allocation4], %s474_s30, %s474_s30, %s475_s5  }
 0x1e1   :  { %470 = dma.done.wait [#allocation4], 256  }
 0x1e2   :  { %471 = vsyncadd [#allocation4], 4294967040 }
 0x1e3   :  { %332 = vsyncpa [#allocation4], 1 }

</bundles_post_ra>
